<compile_context>
chip_gen: v7x
topology: tpu7x:2x2x1
jax: 0.10.0
libtpu: 0.0.40
codegen_flags: <defaults>
</compile_context>

<pallas_src>
import functools

import jax
import jax.numpy as jnp
import numpy as np
from jax.experimental import pallas as pl
from jax.experimental.pallas import tpu as pltpu


def _round_up(x, m):
    return (x + m - 1) // m * m


def _chip_vmem_budget():
    """Per-TensorCore scoped-VMEM budget with ~25% headroom for compiler scratch."""
    try:
        info = pltpu.get_tpu_info()
        cap = int(getattr(info, "vmem_capacity_bytes", 64 << 20))
    except Exception:  # fall back to the conservative (v7x per-core) figure
        cap = 64 << 20
    # v7x: 64 MiB -> 48 MiB; v5e/v6e: 128 MiB -> capped at 96 MiB.
    return max(16 << 20, min((cap * 3) // 4, 96 << 20))


def _choose_tile(p, tn_max):
    """Pick TN (multiple of 128, <= tn_max) and the padded P it must divide.

    Prefers a divisor of the lane-padded P so no extra column padding (and no
    wrapper-side copy of W / target) is needed.
    """
    p128 = _round_up(max(p, 128), 128)
    tn_max = max(128, min((tn_max // 128) * 128, p128))
    best = None
    t = 128
    while t <= tn_max:
        if p128 % t == 0:
            best = t
        t += 128
    if best is not None:
        return best, p128
    return tn_max, _round_up(p128, tn_max)


def _recon_sq_kernel(latent_ref, w_ref, b_ref, target_ref, acc_ref,
                     *, n_valid, n_pad, tn):
    """Accumulate per-(row, lane) partial sums of squared reconstruction error.

    Grid: (core_chunk, P-tile).  acc_ref is the (n_pad, 128) f32 OUTPUT block,
    resident across the inner (reduction) axis -> it doubles as accumulator.
    """
    j = pl.program_id(1)

    @pl.when(j == 0)
    def _init():
        acc_ref[...] = jnp.zeros_like(acc_ref)

    # MXU consumes latent/W in their native dtype (bf16-friendly); f32 acc.
    dec = jnp.dot(latent_ref[...], w_ref[...],
                  preferred_element_type=jnp.float32)               # (n_pad, TN)
    diff = (dec + b_ref[...].astype(jnp.float32)
            - target_ref[...].astype(jnp.float32))

    if n_valid != n_pad:
        # Static branch: mask the batch-padding rows (their diff equals the
        # broadcast bias, which must not contribute to the sum of squares).
        row = jax.lax.broadcasted_iota(jnp.int32, (n_pad, 1), 0)
        diff = jnp.where(row < n_valid, diff, 0.0)

    d2 = diff * diff
    # Fold the TN lanes into the 128-wide accumulator with VPU adds only
    # (lane-boundary slices, no reshape, no cross-lane XLU reduce per step);
    # the single tiny reduction happens in the wrapper on the output.
    part = acc_ref[...]
    for c in range(tn // 128):
        part = part + d2[:, c * 128:(c + 1) * 128]
    acc_ref[...] = part


def elbo_loss_pallas(mean, log_var, noise, w_dec, b_dec, x_input,
                     prior_weight=1e-4, beta=1.0, tn_cap=None):
    n, d = mean.shape
    p = int(np.prod(x_input.shape[1:]))

    # ---- Latent-space work (O(N*d), negligible): pure JAX in the wrapper ----
    mean_f = mean.astype(jnp.float32)
    lv_f = log_var.astype(jnp.float32)
    var = jnp.exp(lv_f)
    prior = -0.5 * jnp.mean(
        jnp.sum(1.0 + lv_f - var - mean_f * mean_f, axis=-1), axis=0)
    mean_stat = jnp.mean(mean_f)
    var_stat = jnp.mean(var)
    latent = jnp.exp(0.5 * lv_f) * noise.astype(jnp.float32) + mean_f

    w_dtype = jnp.dtype(w_dec.dtype)
    t_dtype = jnp.dtype(x_input.dtype)
    b_dtype = jnp.dtype(b_dec.dtype)
    latent = latent.astype(w_dtype)   # cast ONCE so the MXU sees matching dtypes

    # ---- Chip-aware tile sizing ------------------------------------------
    n_pad = _round_up(max(n, 8), 8)             # sublane granularity for M dim
    budget = _chip_vmem_budget()
    # Double-buffered streamed bytes per decoder-output lane.
    bytes_per_lane = (d * w_dtype.itemsize            # W column
                      + n_pad * t_dtype.itemsize      # target column
                      + 8 * b_dtype.itemsize)         # bias (8-sublane padded)
    fixed_bytes = (2 * n_pad * _round_up(d, 128) * w_dtype.itemsize  # latent
                   + 2 * n_pad * 128 * 4                              # acc block
                   + (2 << 20))                                       # headroom
    tn_budget = (budget - fixed_bytes) // (2 * bytes_per_lane)
    tn_budget = max(128, (tn_budget // 128) * 128)
    if tn_cap is not None:
        tn_budget = max(128, min(tn_budget, (int(tn_cap) // 128) * 128))
    tn, p_pad = _choose_tile(p, tn_budget)

    # ---- Pad / reshape the streamed operands ------------------------------
    target = x_input.reshape(n, p)
    if n_pad != n:
        latent = jnp.pad(latent, ((0, n_pad - n), (0, 0)))
        target = jnp.pad(target, ((0, n_pad - n), (0, 0)))
    if p_pad != p:   # ragged P: zero columns contribute exactly 0 to the sum
        w_mat = jnp.pad(w_dec, ((0, 0), (0, p_pad - p)))
        b_vec = jnp.pad(b_dec, (0, p_pad - p))
        target = jnp.pad(target, ((0, 0), (0, p_pad - p)))
    else:
        w_mat, b_vec = w_dec, b_dec
    b_row = b_vec.reshape(1, p_pad)

    total_tiles = p_pad // tn
    # Split the P stream into 2 contiguous chunks (one per v7x TensorCore);
    # on single-TC chips this is just a nested sequential loop.
    nc = 2 if (total_tiles % 2 == 0 and total_tiles >= 2) else 1
    tiles_per_core = total_tiles // nc

    vmem_limit = int(min(budget, max(4 << 20,
                                     2 * tn * bytes_per_lane + fixed_bytes)))

    cost = pl.CostEstimate(
        flops=2 * n_pad * d * p_pad + 4 * n_pad * p_pad,
        transcendentals=0,
        bytes_accessed=(d * p_pad * w_dtype.itemsize
                        + n_pad * p_pad * t_dtype.itemsize
                        + p_pad * b_dtype.itemsize
                        + n_pad * d * w_dtype.itemsize
                        + nc * n_pad * 128 * 4))

    kernel = functools.partial(_recon_sq_kernel,
                               n_valid=n, n_pad=n_pad, tn=tn)

    # TODO(synk): sweep pipeline_mode=pl.Buffered(3) on the W/target specs
    # (re-size TN for 3 buffers first) and pltpu.CORE_PARALLEL on the leading
    # axis for the explicit v7x 2-TensorCore split.
    grid_spec = pltpu.PrefetchScalarGridSpec(
        num_scalar_prefetch=0,
        grid=(nc, tiles_per_core),
        in_specs=[
            # Resident (N_pad, d) latent: same block every step, fetched once.
            pl.BlockSpec((n_pad, d), lambda c, j: (0, 0)),
            # Streamed P-tiles (native dtype, no in-kernel upcast of W).
            pl.BlockSpec((d, tn), lambda c, j: (0, c * tiles_per_core + j)),
            pl.BlockSpec((1, tn), lambda c, j: (0, c * tiles_per_core + j)),
            pl.BlockSpec((n_pad, tn), lambda c, j: (0, c * tiles_per_core + j)),
        ],
        # Per-chunk (N_pad, 128) f32 accumulator block = the kernel output.
        out_specs=pl.BlockSpec((n_pad, 128), lambda c, j: (c, 0)),
    )

    sq_partials = pl.pallas_call(
        kernel,
        out_shape=jax.ShapeDtypeStruct((nc * n_pad, 128), jnp.float32),
        grid_spec=grid_spec,
        compiler_params=pltpu.CompilerParams(
            dimension_semantics=("parallel", "arbitrary"),
            vmem_limit_bytes=vmem_limit),
        cost_estimate=cost,
    )(latent, w_mat, b_row, target)

    recon = jnp.sum(sq_partials) / float(n * p)
    loss = float(prior_weight) * float(beta) * prior + recon
    # TODO(synk): 'bce' reconstruction branch not implemented (mse only).
    return {
        "Loss": loss,
        "Prior Loss": prior,
        "Recon Loss": recon,
        "Mean": mean_stat,
        "Var": var_stat,
    }


def elbo_loss_ref(mean, log_var, noise, w_dec, b_dec, x_input,
                  prior_weight=1e-4, beta=1.0):
    """Pure-JAX reference mirroring the PyTorch module (mse reconstruction)."""
    prior = -0.5 * jnp.mean(
        jnp.sum(1.0 + log_var - jnp.exp(log_var) - mean ** 2, axis=-1), axis=0)
    std = jnp.exp(0.5 * log_var)
    latent = std * noise + mean
    out = latent @ w_dec + b_dec                      # (N, C*H*W)
    target = x_input.reshape(x_input.shape[0], -1)
    recon = jnp.mean((out - target) ** 2)
    return {
        "Loss": prior_weight * beta * prior + recon,
        "Prior Loss": prior,
        "Recon Loss": recon,
        "Mean": jnp.mean(mean),
        "Var": jnp.mean(jnp.exp(log_var)),
    }


if __name__ == "__main__":
    key = jax.random.PRNGKey(0)
    N, C, H, W, D = 2, 4, 16, 16, 32
    P = C * H * W

    k1, k2, k3, k4, k5, k6 = jax.random.split(key, 6)
    mean = jax.random.normal(k1, (N, D), jnp.float32)
    log_var = 0.1 * jax.random.normal(k2, (N, D), jnp.float32)
    x_input = jax.random.normal(k3, (N, C, H, W), jnp.float32)
    noise = jax.random.normal(k4, (N, D), jnp.float32)
    # Deterministic synthetic linear decoder parameters.  (Callers on v5e
    # should keep a bf16 master copy of W for this loss path -- the kernel
    # consumes it natively.)
    w_dec = 0.05 * jax.random.normal(k5, (D, P), jnp.float32)
    b_dec = 0.01 * jax.random.normal(k6, (P,), jnp.float32)

    # tn_cap=256 -> 4 P-tiles split as 2 chunks x 2 steps, exercising the
    # per-chunk accumulator, the batch-padding mask (N=2 -> 8) and the
    # parallel/arbitrary grid.
    result = elbo_loss_pallas(mean, log_var, noise, w_dec, b_dec, x_input,
                              tn_cap=256)
    result = jax.block_until_ready(result)

    ref = elbo_loss_ref(mean, log_var, noise, w_dec, b_dec, x_input)
    for k in ("Loss", "Prior Loss", "Recon Loss", "Mean", "Var"):
        np.testing.assert_allclose(np.asarray(result[k]), np.asarray(ref[k]),
                                   rtol=1e-4, atol=1e-5)

    print("KERNEL_OK")
</pallas_src>

<mosaic_0001>
module attributes {stable_mosaic.version = 11 : i64} {
  func.func @_recon_sq_kernel(%arg0: i32, %arg1: i32, %arg2: memref<8x32xf32, #tpu.memory_space<vmem>>, %arg3: memref<32x256xf32, #tpu.memory_space<vmem>>, %arg4: memref<1x256xf32, #tpu.memory_space<vmem>>, %arg5: memref<8x256xf32, #tpu.memory_space<vmem>>, %arg6: memref<8x128xf32, #tpu.memory_space<vmem>>) attributes {dimension_semantics = [#tpu.dimension_semantics<parallel>, #tpu.dimension_semantics<arbitrary>], iteration_bounds = array<i64: 2, 2>, scalar_prefetch = 0 : i64, scratch_operands = 0 : i64, tpu.core_type = #tpu.core_type<tc>, window_params = [{pipeline_mode = #tpu.pipeline_mode<synchronous>, transform_indices = @transform_0, window_bounds = array<i64: 8, 32>}, {transform_indices = @transform_1, window_bounds = array<i64: 32, 256>}, {transform_indices = @transform_2, window_bounds = array<i64: 1, 256>}, {transform_indices = @transform_3, window_bounds = array<i64: 8, 256>}, {transform_indices = @transform_4, window_bounds = array<i64: 8, 128>}]} {
    %c0_i32 = arith.constant 0 : i32
    %0 = arith.cmpi eq, %arg1, %c0_i32 : i32
    %1 = arith.extui %0 : i1 to i32
    %c0_i32_0 = arith.constant 0 : i32
    %2 = arith.cmpi ne, %1, %c0_i32_0 : i32
    scf.if %2 {
      %cst_13 = arith.constant 0.000000e+00 : f32
      %25 = vector.broadcast %cst_13 : f32 to vector<8x128xf32>
      %c0_14 = arith.constant 0 : index
      %c0_15 = arith.constant 0 : index
      %26 = vector.load %arg6[%c0_14, %c0_15] : memref<8x128xf32, #tpu.memory_space<vmem>>, vector<8x128xf32>
      tpu.vector_store %arg6[%c0_14, %c0_15], %25 {strides = array<i32>} : memref<8x128xf32, #tpu.memory_space<vmem>>, vector<8x128xf32>,
    } else {
    }
    %c0 = arith.constant 0 : index
    %c0_1 = arith.constant 0 : index
    %3 = vector.load %arg2[%c0, %c0_1] : memref<8x32xf32, #tpu.memory_space<vmem>>, vector<8x32xf32>
    %c0_2 = arith.constant 0 : index
    %c0_3 = arith.constant 0 : index
    %4 = vector.load %arg3[%c0_2, %c0_3] : memref<32x256xf32, #tpu.memory_space<vmem>>, vector<32x256xf32>
    %cst = arith.constant dense<0.000000e+00> : vector<8x256xf32>
    %5 = tpu.matmul %3, %4, %cst {dimension_numbers = #tpu.dot_dimension_numbers<[1], [0], [0], [1], [0, 0, 1, 1], [], []>} : vector<8x32xf32>, vector<32x256xf32>, vector<8x256xf32> -> vector<8x256xf32>
    %c0_4 = arith.constant 0 : index
    %c0_5 = arith.constant 0 : index
    %6 = vector.load %arg4[%c0_4, %c0_5] : memref<1x256xf32, #tpu.memory_space<vmem>>, vector<1x256xf32>
    %7 = vector.broadcast %6 : vector<1x256xf32> to vector<8x256xf32>
    %8 = arith.addf %5, %7 : vector<8x256xf32>
    %c0_6 = arith.constant 0 : index
    %c0_7 = arith.constant 0 : index
    %9 = vector.load %arg5[%c0_6, %c0_7] : memref<8x256xf32, #tpu.memory_space<vmem>>, vector<8x256xf32>
    %10 = arith.subf %8, %9 : vector<8x256xf32>
    %11 = tpu.iota {dimensions = array<i32: 0>} : vector<8x1xi32>
    %c2_i32 = arith.constant 2 : i32
    %12 = vector.broadcast %c2_i32 : i32 to vector<8x1xi32>
    %13 = arith.cmpi slt, %11, %12 : vector<8x1xi32>
    %cst_8 = arith.constant 0.000000e+00 : f32
    %14 = vector.shape_cast %13 : vector<8x1xi1> to vector<8x1xi1>
    %15 = vector.broadcast %14 : vector<8x1xi1> to vector<8x256xi1>
    %16 = vector.broadcast %cst_8 : f32 to vector<8x256xf32>
    %17 = arith.select %15, %10, %16 : vector<8x256xi1>, vector<8x256xf32>
    %18 = arith.mulf %17, %17 : vector<8x256xf32>
    %c0_9 = arith.constant 0 : index
    %c0_10 = arith.constant 0 : index
    %19 = vector.load %arg6[%c0_9, %c0_10] : memref<8x128xf32, #tpu.memory_space<vmem>>, vector<8x128xf32>
    %20 = vector.extract_strided_slice %18 {offsets = [0, 0], sizes = [8, 128], strides = [1, 1]} : vector<8x256xf32> to vector<8x128xf32>
    %21 = arith.addf %19, %20 : vector<8x128xf32>
    %22 = vector.extract_strided_slice %18 {offsets = [0, 128], sizes = [8, 128], strides = [1, 1]} : vector<8x256xf32> to vector<8x128xf32>
    %23 = arith.addf %21, %22 : vector<8x128xf32>
    %c0_11 = arith.constant 0 : index
    %c0_12 = arith.constant 0 : index
    %24 = vector.load %arg6[%c0_11, %c0_12] : memref<8x128xf32, #tpu.memory_space<vmem>>, vector<8x128xf32>
    tpu.vector_store %arg6[%c0_11, %c0_12], %23 {strides = array<i32>} : memref<8x128xf32, #tpu.memory_space<vmem>>, vector<8x128xf32>,
    return
  }
  func.func @transform_0(%arg0: i32, %arg1: i32) -> (i32, i32) {
    %c0_i32 = arith.constant 0 : i32
    %c0_i32_0 = arith.constant 0 : i32
    %c0_i32_1 = arith.constant 0 : i32
    return %c0_i32, %c0_i32_0 : i32, i32
  }
  func.func @transform_1(%arg0: i32, %arg1: i32) -> (i32, i32) {
    %c2_i32 = arith.constant 2 : i32
    %0 = arith.muli %arg0, %c2_i32 : i32
    %1 = arith.addi %0, %arg1 : i32
    %c0_i32 = arith.constant 0 : i32
    %c0_i32_0 = arith.constant 0 : i32
    return %c0_i32, %1 : i32, i32
  }
  func.func @transform_2(%arg0: i32, %arg1: i32) -> (i32, i32) {
    %c2_i32 = arith.constant 2 : i32
    %0 = arith.muli %arg0, %c2_i32 : i32
    %1 = arith.addi %0, %arg1 : i32
    %c0_i32 = arith.constant 0 : i32
    %c0_i32_0 = arith.constant 0 : i32
    return %c0_i32, %1 : i32, i32
  }
  func.func @transform_3(%arg0: i32, %arg1: i32) -> (i32, i32) {
    %c2_i32 = arith.constant 2 : i32
    %0 = arith.muli %arg0, %c2_i32 : i32
    %1 = arith.addi %0, %arg1 : i32
    %c0_i32 = arith.constant 0 : i32
    %c0_i32_0 = arith.constant 0 : i32
    return %c0_i32, %1 : i32, i32
  }
  func.func @transform_4(%arg0: i32, %arg1: i32) -> (i32, i32) {
    %c0_i32 = arith.constant 0 : i32
    %c0_i32_0 = arith.constant 0 : i32
    return %arg0, %c0_i32 : i32, i32
  }
}

</mosaic_0001>

<bundles_post_ra>
// kernel: tpu_custom_call.1
= control target key start
LH: loop header
LB: loop body
LE: loop exit
PB: predicated region body
PF: predicated region fallthrough
CT: control target
= control target key end

     0   :  { %s1430_s0 = inlined_call_operand.hbm [shape: f32[8,32], index: 0, kind: input, shape index: {}]   ;;  %s1431_s1 = inlined_call_operand.hbm [shape: f32[32,1024], index: 1, kind: input, shape index: {}]   ;;  %s1432_s2 = inlined_call_operand.hbm [shape: f32[1,1024], index: 2, kind: input, shape index: {}]   ;;  %s1433_s3 = inlined_call_operand.hbm [shape: f32[8,1024], index: 3, kind: input, shape index: {}]   ;;  %s1434_s4 = inlined_call_operand.hbm [shape: f32[16,128], index: 4, kind: output, shape index: {}]  }
   0x1   :  { %1452 = sst [smem:[#allocation25_spill]] %s1431_s1 }
   0x2   :  { %1453 = sst [smem:[#allocation26_spill]] %s1434_s4 }
   0x3   :  { %9 = vsyncpa [#allocation3], 0 }
   0x4   :  { %10 = vsyncpa [#allocation6], 0 }
   0x5   :  { %12 = vsyncpa [#allocation6 + $0x1], 0 }
   0x6   :  { %13 = vsyncpa [#allocation9], 0 }
   0x7   :  { %15 = vsyncpa [#allocation9 + $0x1], 0 }
   0x8   :  { %16 = vsyncpa [#allocation4], 0 }
   0x9   :  { %18 = vsyncpa [#allocation4 + $0x1], 0  ;;  %s1074_s15 = smov 0   ;;  %s1076_s16 = smov 0  }
   0xa   :  { %s1078_s17 = smov 0   ;;  %s1080_s18 = smov 0  }
   0xb   :  { %s1082_s19 = smov 0   ;;  %s1084_s20 = smov 0  }
   0xc   :  { %s1086_s21 = smov 0   ;;  %s1088_s22 = smov 0  }
   0xd   :  { %s1090_s23 = smov 0   ;;  %s1092_s24 = smov 0  }
   0xe   :  { %s1094_s25 = smov 0  }
   0xf LB: > { %1454 = sst [smem:[#allocation15_spill]] %s1005_s17  ;;  %s33_s26 = sadd.s32 1, %s1029_s23  ;;  %s1037_s25 = sphi %s1094_s25, %s24_s25   ;;  %s1033_s24 = sphi %s1092_s24, %s1494_s24   ;;  %s1029_s23 = sphi %s1090_s23, %s1493_s23   ;;  %s1025_s22 = sphi %s1088_s22, %s1492_s22   ;;  %s1021_s21 = sphi %s1086_s21, %s1491_s21   ;;  %s1017_s20 = sphi %s1084_s20, %s1490_s20   ;;  %s1013_s19 = sphi %s1082_s19, %s1498_s19   ;;  %s1009_s18 = sphi %s1080_s18, %s1497_s18   ;;  %s1005_s17 = sphi %s1078_s17, %s1488_s17   ;;  %s1001_s16 = sphi %s1076_s16, %s1496_s16   ;;  %s997_s15 = sphi %s1074_s15, %s1495_s15  }
  0x10   : > { %1455 = sst [smem:[#allocation16_spill]] %s1017_s20  ;;  %s36_s27 = sadd.s32 1, %s1033_s24 }
  0x11   : > { %1456 = sst [smem:[#allocation17_spill]] %s1025_s22  ;;  %p34_p0 = scmp.ge.s32.totalorder %s33_s26, 2 }
  0x12   : > { %1457 = sst [smem:[#allocation18_spill]] %s1029_s23  ;;  %s617_s28 = sshll.u32 %s1033_s24, 1 }
  0x13   : > { %1458 = sst [smem:[#allocation19_spill]] %s1033_s24  ;;  %s1133_s29 = sadd.s32 %s1029_s23, %s617_s28 }
  0x14   : > { %s68_s30 = sadd.s32 1, %s1017_s20  ;;  %s1500_s26 = smov (%p34_p0, %s33_s26), 0 }
  0x15   : > { %1459 = sst [smem:[#allocation20_spill]] %s1500_s26  ;;  %s1502_s27 = smov (!%p34_p0, %s36_s27), %s1033_s24 }
  0x16   : > { %p75_p1 = scmp.ne.s32.totalorder %s1017_s20, %s1013_s19  ;;  %p76_p2 = scmp.eq.s32.totalorder %s1037_s25, 0 }
  0x17   : > { %p38_p3 = scmp.ge.s32.totalorder %s1502_s27, 2  ;;  %p692_p5 = scmp.lt.s32.totalorder %s1037_s25, 4 }
  0x18   : > { %p1142_p4 = por %p76_p2, %p75_p1  ;;  %s202_s6 = sand.u32 1, %s1037_s25  }
  0x19   : > { %s1504_s27 = smov (%p38_p3, %s1502_s27), 0  ;;  %s1151_s7 = sand.u32 1, %s1017_s20  }
  0x1a   : > { %1461 = sst [smem:[#allocation21_spill]] %s1504_s27  ;;  %s618_s8 = sshll.u32 %s1504_s27, 1 }
  0x1b   : > { %s64_s9 = sadd.s32 %s618_s8, %s1500_s26  ;;  %s626_s10 = sshll.u32 %s1151_s7, 6 }
  0x1c   : > { %s65_s11 = ssub.s32 %s1133_s29, %s64_s9  ;;  %s1437_s12 = sshll.u32 %s1133_s29, 8 }
  0x1d   : > { %p66_p6 = scmp.eq.s32.totalorder %s65_s11, 0  ;;  %s1462_s1 = sld [smem:[#allocation25_spill]] }
  0x1e   : > { %s206_s23 = scalar_lea.vmem [#allocation5], %s626_s10  ;;  %p1174_p7 = pnand %p692_p5, %p1142_p4 }
  0x1f   : > { %s215_s4 = sshll.u32 %s206_s23, 4  ;;  %s1178_s9 = scalar_lea.sflag [#allocation6], %s202_s6  ;;  %s1168_s4 = int_to_ptr.vmem [resolvable:$true] %s215_s4 }
  0x20   : > { %s1166_s22 = scalar_select %p66_p6, %s1017_s20, %s68_s30  }
  0x21   : > { %s1464_s8 = scalar_select %p1174_p7, 1, 0 }
  0x22   : > { %1463 = sst [smem:[#allocation22_spill]] %s1166_s22  ;;  %p1184_p9 = pneg %p1174_p7 }
  0x23   : > { %s1163_s28 = scalar_lea.hbm %s1462_s1, %s1437_s12  ;;  %s794_s5 = scalar_lea.hbm %s1462_s1, 4096 }
  0x24   : > { %s789_s11 = scalar_lea.hbm %s1163_s28, 1024  ;;  %p795_p12 = scmp.lt.u32.totalorder %s1163_s28, %s1462_s1 }
  0x25   : > { %p790_p8 = scmp.ne.s32.totalorder %s1163_s28, %s789_s11  ;;  %p796_p13 = scmp.lt.u32.totalorder %s794_s5, %s789_s11 }
  0x26   : > { %s1465_s13 = scalar_select %p1184_p9, 1, 0 }
  0x27   : > { %p792_p10 = pnand %p1184_p9, %p790_p8  ;;  %p797_p0 = por %p796_p13, %p795_p12 }
  0x28   : > { %p798_p1 = scmp.lt.u32.totalorder %s789_s11, %s1163_s28 }
  0x29   : > { %p793_p11 = pneg %p792_p10 }
  0x2a   : > { %p799_p2 = por %p798_p1, %p797_p0 }
  0x2c   : > { %p800_p3 = pnand %p799_p2, %p793_p11 }
  0x2e   : > { %803 = shalt.err (!%p800_p3)
}
  0x2f   : > { %s804_s6 = scalar_lea.vmem %s1168_s4, 1024  ;;  %s1039_s23 = smov [#allocation5]  }
  0x30   : > { %p805_p4 = scmp.ne.s32.totalorder %s1168_s4, %s804_s6  ;;  %s809_s30 = sshll.u32 %s1039_s23, 4  ;;  %s810_s30 = int_to_ptr.vmem [resolvable:$false] %s809_s30 }
  0x31   : > { %s811_s10 = scalar_lea.vmem %s810_s30, 2048  ;;  %p812_p8 = scmp.lt.s32.totalorder %s1168_s4, %s810_s30 }
  0x32   : > { %p807_p5 = pnand %p805_p4, %p1184_p9  ;;  %p813_p10 = scmp.lt.s32.totalorder %s811_s10, %s804_s6 }
  0x34   : > { %p808_p6 = pneg %p807_p5  ;;  %p814_p12 = por %p813_p10, %p812_p8 }
  0x36   : > { %p815_p13 = pnand %p814_p12, %p808_p6 }
  0x38   : > { %818 = shalt.err (!%p815_p13)
}
  0x39   : > { %s1040_s11 = smov 1024   ;;  %s1041_s5 = smov 256  }
  0x3a   : > { %s1042_s14 = smov 16   ;;  %s1209_s6 = sadd.s32 4294967295, %s1037_s25  }
  0x3b   : > { %680 = dma.hbm_to_vmem [thread:$0]  (!%p1174_p7), %s1163_s28, 1024, %s1168_s4, %s1178_s9, %s1040_s11, %s1041_s5, %s1042_s14  }
  0x3c   : > { %s616_s23 = sadd.s32 4294967294, %s1037_s25   ;;  %p81_p11 = scmp.ne.s32.totalorder %s1013_s19, %s1009_s18 }
  0x3d   : > { %p1444_p0 = scmp.eq.s32.totalorder %s1209_s6, 0  ;;  %s151_s30 = ssub.s32 %s1033_s24, %s1504_s27 }
  0x3e   : > { %s154_s10 = sadd.s32 1, %s1005_s17  ;;  %p152_p2 = scmp.eq.s32.totalorder %s151_s30, 0 }
  0x3f   : > { %p1220_p1 = por %p1444_p0, %p81_p11  ;;  %p164_p3 = scmp.ne.s32.totalorder %s1005_s17, %s1001_s16 }
  0x40   : > { %p165_p4 = scmp.eq.s32.totalorder %s1209_s6, 3  ;;  %p170_p6 = scmp.ne.s32.totalorder %s1001_s16, %s997_s15 }
  0x41   : > { %s1466_s12 = scalar_select %p1220_p1, 1, 0 }
  0x42   : > { %s1228_s4 = scalar_select %p152_p2, %s1005_s17, %s154_s10  }
  0x43   : > { %p1230_p5 = por %p165_p4, %p164_p3  ;;  %p171_p8 = scmp.eq.s32.totalorder %s616_s23, 3 }
  0x44   : > { %1467 = sst [smem:[#allocation23_spill]] %s1228_s4  ;;  %p623_p10 = scmp.ge.s32.totalorder %s1037_s25, 1 }
  0x45   : > { %s1468_s28 = scalar_select %p1230_p5, 1, 0 }
  0x46   : > { %p178_p12 = scmp.lt.s32.totalorder %s1037_s25, 5  ;;  %p1238_p13 = por %p171_p8, %p170_p6 }
  0x47   : > { %s1043_s5 = smov [#allocation2]   ;;  %s630_s30 = sshll.u32 %s1151_s7, 1 }
  0x48   : > { %s1469_s18 = scalar_select %p1238_p13, 1, 0 }
  0x49   : > { %p1242_p11 = pnand %p623_p10, %p178_p12  ;;  %s191_s14 = sshll.u32 %s1043_s5, 4  ;;  %s192_s14 = int_to_ptr.vmem [resolvable:$true] %s191_s14 }
  0x4a   : > { %1470 = sst [smem:[#allocation24_spill]] %s1469_s18  ;;  %s651_s10 = sshll.u32 %s1133_s29, 5 }
  0x4b   : > { %s1471_s11 = scalar_select %p1242_p11, 1, 0 }
  0x4c   : > { %p673_p2 = pneg %p1242_p11  ;;  %s229_s23 = scalar_lea.vmem [#allocation7], %s630_s30 }
  0x4d   : > { %s239_s1 = sshll.u32 %s229_s23, 4  ;;  %s1259_s22 = scalar_lea.hbm %s1432_s2, %s651_s10  ;;  %s1261_s1 = int_to_ptr.vmem [resolvable:$true] %s239_s1 }
  0x4e   : > { %p1252_p3 = pnand %p673_p2, %p1444_p0  ;;  %s634_s5 = sshll.u32 %s1151_s7, 4 }
  0x4f   : > { %s819_s17 = scalar_lea.hbm %s1430_s0, 128 }
  0x50   : > { %p820_p4 = scmp.ne.s32.totalorder %s1430_s0, %s819_s17  ;;  %p821_p6 = pneg %p1252_p3 }
  0x51   : > { %p826_p12 = scmp.lt.u32.totalorder %s819_s17, %s1430_s0 }
  0x52   : > { %p822_p8 = pnand %p821_p6, %p820_p4 }
  0x54   : > { %p823_p10 = pneg %p822_p8 }
  0x56   : > { %p828_p2 = pnand %p826_p12, %p823_p10 }
  0x58   : > { %831 = shalt.err (!%p828_p2)
}
  0x59   : > { %s832_s26 = scalar_lea.vmem %s192_s14, 128  ;;  %p840_p1 = scmp.lt.s32.totalorder %s192_s14, %s192_s14 }
  0x5a   : > { %p833_p0 = scmp.ne.s32.totalorder %s192_s14, %s832_s26  ;;  %p841_p11 = scmp.lt.s32.totalorder %s832_s26, %s832_s26 }
  0x5c   : > { %p835_p13 = pnand %p833_p0, %p821_p6  ;;  %p842_p7 = por %p841_p11, %p840_p1 }
  0x5e   : > { %p836_p5 = pneg %p835_p13 }
  0x60   : > { %p843_p9 = pnand %p842_p7, %p836_p5 }
  0x62   : > { %846 = shalt.err (!%p843_p9)
}
  0x63   : > { %676 = dma.hbm_to_vmem [thread:$0]  (!%p1252_p3), %s1430_s0, 128, %s192_s14, [#allocation3]  }
  0x64   : > { %s847_s17 = scalar_lea.hbm %s1259_s22, 32  ;;  %p1473_p0 = scmp.ne.s32.totalorder %s1465_s13, 0 }
  0x65   : > { %p848_p4 = scmp.ne.s32.totalorder %s1259_s22, %s847_s17  ;;  %s852_s30 = scalar_lea.hbm %s1432_s2, 128 }
  0x66   : > { %p853_p7 = scmp.lt.u32.totalorder %s1259_s22, %s1432_s2  ;;  %p854_p9 = scmp.lt.u32.totalorder %s852_s30, %s847_s17 }
  0x67   : > { %p850_p13 = pnand %p848_p4, %p1473_p0  ;;  %p856_p5 = scmp.lt.u32.totalorder %s847_s17, %s1259_s22 }
  0x68   : > { %p855_p1 = por %p854_p9, %p853_p7 }
  0x69   : > { %p851_p6 = pneg %p850_p13 }
  0x6a   : > { %p857_p11 = por %p856_p5, %p855_p1 }
  0x6c   : > { %p858_p8 = pnand %p857_p11, %p851_p6 }
  0x6e   : > { %861 = shalt.err (!%p858_p8)
}
  0x6f   : > { %s862_s14 = scalar_lea.vmem %s1261_s1, 32  ;;  %s1044_s24 = smov [#allocation7]  }
  0x70   : > { %p863_p3 = scmp.ne.s32.totalorder %s1261_s1, %s862_s14  ;;  %s867_s26 = sshll.u32 %s1044_s24, 4  ;;  %s868_s26 = int_to_ptr.vmem [resolvable:$false] %s867_s26 }
  0x71   : > { %s869_s20 = scalar_lea.vmem %s868_s26, 64  ;;  %p870_p2 = scmp.lt.s32.totalorder %s1261_s1, %s868_s26 }
  0x72   : > { %p865_p10 = pnand %p863_p3, %p1473_p0  ;;  %p871_p4 = scmp.lt.s32.totalorder %s869_s20, %s862_s14 }
  0x74   : > { %p866_p12 = pneg %p865_p10  ;;  %p872_p13 = por %p871_p4, %p870_p2 }
  0x76   : > { %p873_p7 = pnand %p872_p13, %p866_p12 }
  0x78   : > { %876 = shalt.err (!%p873_p7)
}
  0x79   : > { %p1474_p6 = scmp.ne.s32.totalorder %s1464_s8, 0  ;;  %s1475_s4 = sshll.u32 %s1133_s29, 8 }
  0x7a   : > { %s1307_s10 = scalar_lea.hbm %s1433_s3, %s1475_s4  ;;  %s250_s30 = scalar_lea.vmem [#allocation8], %s634_s5 }
  0x7b   : > { %683 = dma.hbm_to_vmem [thread:$0]  (!%p1474_p6), %s1259_s22, 32, %s1261_s1, %s1178_s9  }
  0x7c   : > { %s260_s23 = sshll.u32 %s250_s30, 4  ;;  %s247_s27 = scalar_lea.sflag [#allocation9], %s1151_s7  ;;  %s261_s23 = int_to_ptr.vmem [resolvable:$true] %s260_s23 }
  0x7d   : > { %s877_s14 = scalar_lea.hbm %s1307_s10, 256  ;;  %s882_s29 = scalar_lea.hbm %s1433_s3, 1024 }
  0x7e   : > { %p878_p9 = scmp.ne.s32.totalorder %s1307_s10, %s877_s14  ;;  %p883_p11 = scmp.lt.u32.totalorder %s1307_s10, %s1433_s3 }
  0x7f   : > { %p884_p8 = scmp.lt.u32.totalorder %s882_s29, %s877_s14  ;;  %p886_p10 = scmp.lt.u32.totalorder %s877_s14, %s1307_s10 }
  0x80   : > { %p880_p1 = pnand %p878_p9, %p1473_p0 }
  0x81   : > { %p885_p3 = por %p884_p8, %p883_p11 }
  0x82   : > { %p881_p5 = pneg %p880_p1 }
  0x83   : > { %p887_p12 = por %p886_p10, %p885_p3 }
  0x85   : > { %p888_p2 = pnand %p887_p12, %p881_p5 }
  0x87   : > { %891 = shalt.err (!%p888_p2)
}
  0x88   : > { %s892_s7 = scalar_lea.vmem %s261_s23, 256  ;;  %s1045_s5 = smov [#allocation8]  }
  0x89   : > { %p893_p4 = scmp.ne.s32.totalorder %s261_s23, %s892_s7  ;;  %s897_s26 = sshll.u32 %s1045_s5, 4  ;;  %s898_s26 = int_to_ptr.vmem [resolvable:$false] %s897_s26 }
  0x8a   : > { %s899_s20 = scalar_lea.vmem %s898_s26, 512  ;;  %p900_p9 = scmp.lt.s32.totalorder %s261_s23, %s898_s26 }
  0x8b   : > { %p895_p13 = pnand %p893_p4, %p1473_p0  ;;  %p901_p1 = scmp.lt.s32.totalorder %s899_s20, %s892_s7 }
  0x8d   : > { %p896_p7 = pneg %p895_p13  ;;  %p902_p6 = por %p901_p1, %p900_p9 }
  0x8f   : > { %p903_p8 = pnand %p902_p6, %p896_p7 }
  0x91   : > { %906 = shalt.err (!%p903_p8)
}
  0x92   : > { %p1476_p11 = scmp.ne.s32.totalorder %s1464_s8, 0  ;;  %p1477_p5 = scmp.ne.s32.totalorder %s1471_s11, 0 }
  0x93   : > { %p1478_p3 = scmp.eq.s32.totalorder (!%p1477_p5), %s1209_s6, 0 }
  0x94   : > { %686 = dma.hbm_to_vmem [thread:$0]  (!%p1476_p11), %s1307_s10, 256, %s261_s23, %s247_s27  }
  0x95   : > { %269 = sbr.rel (%p1477_p5) target bundleno = 423 (0x1a7), region = 36 }
  0x9c   : > { %980 = dma.done.wait (%p1478_p3), [#allocation3], 128   ;;  %p1479_p0 = pmov %p1478_p3 }
  0x9d   : > { %s275_s13 = sand.u32 1, %s1209_s6   ;;  %s277_s4 = sand.u32 1, %s1013_s19  }
  0x9e   : > { %982 = vsyncadd (%p1479_p0), [#allocation3], 4294967168  ;;  %s640_s17 = sshll.u32 %s277_s4, 6  ;;  %s276_s18 = scalar_lea.sflag [#allocation6], %s275_s13 }
  0x9f   : > { %s279_s30 = scalar_lea.vmem [#allocation5], %s640_s17  ;;  %p1480_p6 = scmp.ne.s32.totalorder %s1466_s12, 0 }
  0xa1   : > { %984 = dma.done.wait (%p1480_p6), %s276_s18, 1056  }
  0xa2   : > { %986 = vsyncadd (%p1480_p6), %s276_s18, 4294966240  ;;  %s641_s8 = sshll.u32 %s277_s4, 1  ;;  %s642_s11 = sshll.u32 %s277_s4, 4 }
  0xa3   : > { %s1341_s10 = scalar_lea.vmem [#allocation7], %s641_s8  ;;  %s294_s23 = scalar_lea.sflag [#allocation9], %s277_s4 }
  0xa4   : > { %s1343_s27 = scalar_lea.vmem [#allocation8], %s642_s11 }
  0xa5   : > { %988 = dma.done.wait (%p1480_p6), %s294_s23, 256  }
  0xa6   : > { %990 = vsyncadd (%p1480_p6), %s294_s23, 4294967040  ;;  %s329_s6 = sand.u32 1, %s1001_s16   ;;  %p644_p10 = scmp.ne.s32.totalorder %s1021_s21, 0 }
  0xa7   : > { %s643_s14 = sshll.u32 %s329_s6, 3  ;;  %v1046_v0 = vmov (!%p644_p10), 0.0  }
  0xa8   : > { %s1352_s1 = scalar_lea.vmem [#allocation10], %s643_s14  ;;  %344 = sbr.rel (%p644_p10) target bundleno = 175 (0xaf), region = 56 }
  0xa9   : > { %345 = vst [vmem:[%s1352_s1] sm:$0xff] (!%p644_p10), %v1046_v0 }
  0xaf PF: > { %v348_v1 = vld [vmem:[%s279_s30 + $0x8] sm:$0xff]  ;;  %v350_v2 = vld [vmem:[%s279_s30 + $0x18] sm:$0xff]  ;;  %v347_v3 = vld [vmem:[%s279_s30] sm:$0xff]  ;;  %v1047_v8 = vmov 0.0   ;;  %vm367_vm0 = vcmask 261120   ;;  %v357_v15 = vlaneseq  ;;  %s1481_s21 = sld [smem:[#allocation17_spill]] }
  0xb0   : > { %v653_v4 = vpack.c.bf16 %v350_v2, %v348_v1  ;;  %v349_v5 = vld [vmem:[%s279_s30 + $0x10] sm:$0xff]  ;;  %v352_v6 = vld [vmem:[%s279_s30 + $0x28] sm:$0xff]  ;;  %v354_v7 = vld [vmem:[%s279_s30 + $0x38] sm:$0xff]  ;;  %435 = vmatprep.mubr.f32.mxu0 %v1047_v8  ;;  %s473_s22 = sshll.u32 %s1352_s1, 4  ;;  %s1482_s24 = sld [smem:[#allocation26_spill]]  ;;  %s1367_s22 = int_to_ptr.vmem [resolvable:$true] %s473_s22 }
  0xb1   : > { %v655_v9 = vpack.c.bf16 %v349_v5, %v347_v3  ;;  %v657_v10 = vpack.c.bf16 %v354_v7, %v352_v6  ;;  %v351_v11 = vld [vmem:[%s279_s30 + $0x20] sm:$0xff]  ;;  %v353_v12 = vld [vmem:[%s279_s30 + $0x30] sm:$0xff]  ;;  %v346_v14 = vld [vmem:[#allocation2] sm:$0xff]  ;;  %v358_v16 = vshrl.u32 %v357_v15, 7  ;;  %s460_s26 = scalar_lea.sflag [#allocation4], %s329_s6  ;;  %s907_s20 = scalar_lea.vmem %s1367_s22, 128 }
  0xb2   : > { %654 = vmatprep.subr.bf16.mxu0 %v653_v4  ;;  %v659_v13 = vpack.c.bf16 %v353_v12, %v351_v11  ;;  %v355_v18 = vld [vmem:[%s1341_s10] sm:$0x3]  ;;  %v442_v23 = vld [vmem:[%s1343_s27] sm:$0xff]  ;;  %p908_p12 = scmp.ne.s32.totalorder %s1367_s22, %s907_s20  ;;  %p1484_p2 = scmp.ne.s32.totalorder %s1468_s28, 0 }
  0xb3   : > { %656 = vmatpush1.bf16.msra.mxu0 %v655_v9  ;;  %v359_v17 = vsub.s32 0, %v358_v16  ;;  %v363_v19 = vsub.s32 1, %v358_v16  ;;  %v443_v26 = vld [vmem:[%s1343_s27 + $0x8] sm:$0xff]  ;;  %vm448_vm1 = vcmp.lt.s32.totalorder %v358_v16, 2  ;;  %v455_v31 = vld [vmem:[%s1352_s1] sm:$0xff]  ;;  %s1048_s13 = smov [#allocation10]  }
  0xb4   : > { %658 = vmatprep.subr.bf16.mxu0 %v657_v10  ;;  %p909_p4 = pnand %p908_p12, %p1484_p2  ;;  %s911_s4 = sshll.u32 %s1048_s13, 4  ;;  %s912_s4 = int_to_ptr.vmem [resolvable:$false] %s911_s4 }
  0xb5   : > { %v360_v20 = vrot.slane %v355_v18, %v359_v17  ;;  %v364_v21 = vrot.slane %v355_v18, %v363_v19  ;;  %s647_s12 = sshll.u32 %s1481_s21, 7  ;;  %s913_s17 = scalar_lea.vmem %s912_s4, 256 }
  0xb6   : > { %s1483_s7 = smov %s1482_s24  ;;  %s1365_s5 = scalar_lea.hbm %s1482_s24, %s647_s12 }
  0xb7   : > { %660 = vmatpush1.bf16.msra.mxu0 %v659_v13  ;;  %p910_p13 = pneg %p909_p4  ;;  %p914_p7 = scmp.lt.s32.totalorder %s1367_s22, %s912_s4 }
  0xb8   : > { %p915_p9 = scmp.lt.s32.totalorder %s913_s17, %s907_s20 }
  0xba   : > { %645 = vmatmul.mubr.msk.f32.vlgmr.msra.gmra.mrb[0].mxu0 %vm367_vm0, %v346_v14  ;;  %p916_p1 = por %p915_p9, %p914_p7 }
  0xbc   : > { %p917_p8 = pnand %p916_p1, %p910_p13 }
 0x18d   : > { %v437_v22 = vpop.f32.mrb[0].mxu0 }
 0x18e   : > { %v438_v24 = vadd.f32 %v437_v22, %v360_v20  ;;  %v439_v25 = vpop.f32.mrb[1].mxu0 }
 0x18f   : > { %v440_v27 = vadd.f32 %v439_v25, %v364_v21 }
 0x190   : > { %v444_v28 = vsub.f32 %v438_v24, %v442_v23 }
 0x191   : > { %v445_v29 = vsub.f32 %v440_v27, %v443_v26 }
 0x192   : > { %v451_v30 = vsel %vm448_vm1, %v444_v28, 0.0 }
 0x193   : > { %v453_v32 = vmul.f32 %v451_v30, %v451_v30  ;;  %v452_v33 = vsel %vm448_vm1, %v445_v29, 0.0 }
 0x194   : > { %v454_v34 = vmul.f32 %v452_v33, %v452_v33 }
 0x195   : > { %v456_v35 = vadd.f32 %v455_v31, %v453_v32 }
 0x197   : > { %v457_v36 = vadd.f32 %v456_v35, %v454_v34 }
 0x199   : > { %458 = vst [vmem:[%s1352_s1] sm:$0xff] %v457_v36 }
 0x19a   : > { %920 = shalt.err (!%p917_p8)
}
 0x19b   : > { %s921_s18 = scalar_lea.hbm %s1365_s5, 128  ;;  %s925_s11 = scalar_lea.hbm %s1483_s7, 256 }
 0x19c   : > { %p922_p11 = scmp.ne.s32.totalorder %s1365_s5, %s921_s18  ;;  %p926_p0 = scmp.lt.u32.totalorder %s1365_s5, %s1483_s7 }
 0x19d   : > { %p927_p6 = scmp.lt.u32.totalorder %s925_s11, %s921_s18  ;;  %p929_p12 = scmp.lt.u32.totalorder %s921_s18, %s1365_s5 }
 0x19e   : > { %p923_p5 = pnand %p922_p11, %p1484_p2 }
 0x19f   : > { %p928_p10 = por %p927_p6, %p926_p0 }
 0x1a0   : > { %p924_p3 = pneg %p923_p5 }
 0x1a1   : > { %p930_p4 = por %p929_p12, %p928_p10 }
 0x1a3   : > { %p931_p13 = pnand %p930_p4, %p924_p3 }
 0x1a5   : > { %934 = shalt.err (!%p931_p13)
}
 0x1a6   : > { %671 = dma.vmem_to_hbm [thread:$0]  (%p1484_p2), %s1367_s22, 128, %s1365_s5, %s460_s26  }
 0x1a7 PF: > { %s1485_s27 = sld [smem:[#allocation24_spill]]  ;;  %p694_p7 = scmp.ge.s32.totalorder %s1037_s25, 2 }
 0x1a8   : > { %s485_s6 = sand.u32 1, %s997_s15  }
 0x1a9   : > { %s486_s14 = scalar_lea.sflag [#allocation4], %s485_s6 }
 0x1ad   : > { %p1486_p9 = scmp.ne.s32.totalorder %s1485_s27, 0 }
 0x1af   : > { %p688_p1 = pnand %p694_p7, %p1486_p9 }
 0x1b1   : > { %992 = dma.done.wait (!%p688_p1), %s486_s14, 128  }
 0x1b2   : > { %994 = vsyncadd (!%p688_p1), %s486_s14, 4294967168  ;;  %s24_s25 = sadd.s32 1, %s1037_s25   ;;  %s1487_s1 = sld [smem:[#allocation15_spill]] }
 0x1b3   : > { %p21_p8 = scmp.ge.s32.totalorder %s24_s25, 6   ;;  %s1488_s17 = sld [smem:[#allocation23_spill]] }
 0x1b4   : > { %s1489_s28 = sld [smem:[#allocation16_spill]]  ;;  %s1490_s20 = sld [smem:[#allocation22_spill]] }
 0x1b5   : > { %s1491_s21 = sld [smem:[#allocation18_spill]]  ;;  %s1492_s22 = sld [smem:[#allocation19_spill]] }
 0x1b6   : > { %s1493_s23 = sld [smem:[#allocation20_spill]]  ;;  %s1494_s24 = sld [smem:[#allocation21_spill]] }
 0x1b7   : > { %s1495_s15 = smov %s1001_s16  ;;  %s1497_s18 = smov %s1013_s19 }
 0x1b8   : > { %s1496_s16 = smov %s1487_s1  ;;  %23 = sbr.rel (!%p21_p8) target bundleno = 15 (0xf), region = 114 }
 0x1ba   : > { %s1498_s19 = smov %s1489_s28 }
 0x1bf   :  { %491 = vsyncpa [#allocation3], 1 }
 0x1c0   :  { %493 = vsyncpa [#allocation3 + $0x1], 1 }
 0x1c1   :  { %494 = vsyncpa [#allocation6], 1 }
 0x1c2   :  { %496 = vsyncpa [#allocation6 + $0x1], 1 }
 0x1c3   :  { %497 = vsyncpa [#allocation9], 1 }
 0x1c4   :  { %499 = vsyncpa [#allocation9 + $0x1], 1 }
 0x1c5   :  { %500 = vsyncpa [#allocation4], 1 }
 0x1c6   :  { %502 = vsyncpa [#allocation4 + $0x1], 1 }

</bundles_post_ra>
